<compile_context>
chip_gen: v5e
topology: v5e:2x2
jax: 0.10.0
libtpu: 0.0.40
codegen_flags: <defaults>
</compile_context>

<pallas_src>
import functools

import jax
import jax.numpy as jnp
from jax.experimental import pallas as pl
from jax.experimental.pallas import tpu as pltpu


def _round_up(x, m):
    return ((x + m - 1) // m) * m


def _ppo_fused_kernel(x_ref, w1_ref, b1_ref, w2_ref, b2_ref, out_ref, *, action_dim):
    x = x_ref[...]                                                   # (TB, S)

    # Fused first layers (policy || value) + ReLU.
    h = jnp.dot(x, w1_ref[...], preferred_element_type=jnp.float32) + b1_ref[...]
    h = jnp.maximum(h, 0.0)                                          # (TB, 2H)

    # Fused block-diagonal second layers: lanes [0, A) are policy logits,
    # lane A is the value, lanes > A are zero padding.
    z = jnp.dot(h, w2_ref[...], preferred_element_type=jnp.float32) + b2_ref[...]

    col = jax.lax.broadcasted_iota(jnp.int32, z.shape, dimension=1)
    is_prob = col < action_dim

    # Masked, max-subtracted softmax over the first `action_dim` lanes only.
    logits = jnp.where(is_prob, z, jnp.float32(-1e30))
    m = jnp.max(logits, axis=-1, keepdims=True)
    e = jnp.exp(logits - m)                                          # masked lanes underflow to 0
    denom = jnp.sum(e, axis=-1, keepdims=True)
    probs = e * pl.reciprocal(denom, approx=False)

    # Lane-dense combined output slab: [probs | value | zeros].
    out = jnp.where(col == action_dim, z, probs)
    out_ref[...] = out.astype(out_ref.dtype)


def ppo_policy_forward(state, params, *, block_b=512):
    """state: (B, state_dim) float32. Returns (probs (B, A), value (B,))."""
    state = jnp.asarray(state, jnp.float32)
    B, S = state.shape
    H = params["w1p"].shape[1]
    A = params["w2p"].shape[1]
    out_pad = _round_up(max(A + 1, 128), 128)                        # lane-dense output width

    # ---- pack fused weights (tiny; plain JAX, outside the kernel) ----
    w1 = jnp.concatenate([params["w1p"], params["w1v"]], axis=1)                 # (S, 2H)
    b1 = jnp.concatenate([params["b1p"], params["b1v"]], axis=1)                 # (1, 2H)
    w2 = jnp.zeros((2 * H, out_pad), jnp.float32)
    w2 = w2.at[:H, :A].set(params["w2p"])                                        # policy logits
    w2 = w2.at[H:, A].set(params["w2v"][:, 0])                                   # value column
    b2 = jnp.zeros((1, out_pad), jnp.float32)
    b2 = b2.at[0, :A].set(params["b2p"][0])
    b2 = b2.at[0, A].set(params["b2v"][0, 0])

    # ---- batch tiling: TB <= 512 rows; double-buffered tiles stay far under the
    #      32 MiB scoped-VMEM default: 2*(TB*(S+out_pad)+|W|)*4B << 32 MiB ----
    tb = min(block_b, _round_up(B, 8))
    b_pad = _round_up(B, tb)
    if b_pad != B:
        state = jnp.pad(state, ((0, b_pad - B), (0, 0)))

    grid = (b_pad // tb,)
    cost = pl.CostEstimate(
        flops=2 * b_pad * (S * 2 * H + 2 * H * out_pad),
        transcendentals=b_pad * out_pad,
        bytes_accessed=4 * (b_pad * S + b_pad * out_pad
                            + w1.size + b1.size + w2.size + b2.size),
    )

    out = pl.pallas_call(
        functools.partial(_ppo_fused_kernel, action_dim=A),
        out_shape=jax.ShapeDtypeStruct((b_pad, out_pad), jnp.float32),
        grid=grid,
        in_specs=[
            pl.BlockSpec((tb, S), lambda i: (i, 0)),                 # state tile (pipelined)
            pl.BlockSpec((S, 2 * H), lambda i: (0, 0)),              # weights: constant blocks,
            pl.BlockSpec((1, 2 * H), lambda i: (0, 0)),              #   fetched once, VMEM-resident
            pl.BlockSpec((2 * H, out_pad), lambda i: (0, 0)),
            pl.BlockSpec((1, out_pad), lambda i: (0, 0)),
        ],
        out_specs=pl.BlockSpec((tb, out_pad), lambda i: (i, 0)),
        compiler_params=pltpu.CompilerParams(
            dimension_semantics=("parallel",),                       # shard tiles across v7x TCs
        ),
        cost_estimate=cost,
    )(state, w1, b1, w2, b2)

    probs = out[:B, :A]
    value = out[:B, A]
    return probs, value


def init_params(key, state_dim, action_dim, hidden_dim):
    """Deterministic init; weights stored as (in, out) so the kernel does x @ W + b."""
    ks = jax.random.split(key, 8)

    def lin(kw, kb, fan_in, fan_out):
        # Mimic PyTorch Linear default init: U(-1/sqrt(fan_in), 1/sqrt(fan_in)).
        bound = 1.0 / float(fan_in) ** 0.5
        w = jax.random.uniform(kw, (fan_in, fan_out), jnp.float32, -bound, bound)
        b = jax.random.uniform(kb, (1, fan_out), jnp.float32, -bound, bound)
        return w, b

    w1p, b1p = lin(ks[0], ks[1], state_dim, hidden_dim)
    w2p, b2p = lin(ks[2], ks[3], hidden_dim, action_dim)
    w1v, b1v = lin(ks[4], ks[5], state_dim, hidden_dim)
    w2v, b2v = lin(ks[6], ks[7], hidden_dim, 1)
    return dict(w1p=w1p, b1p=b1p, w2p=w2p, b2p=b2p,
                w1v=w1v, b1v=b1v, w2v=w2v, b2v=b2v)


if __name__ == "__main__":
    B, STATE_DIM, ACTION_DIM, HIDDEN_DIM = 8, 16, 4, 32

    key = jax.random.PRNGKey(0)
    k_params, k_state = jax.random.split(key)
    params = init_params(k_params, STATE_DIM, ACTION_DIM, HIDDEN_DIM)
    state = jax.random.normal(k_state, (B, STATE_DIM), jnp.float32)

    probs, value = ppo_policy_forward(state, params)
    jax.block_until_ready((probs, value))

    # Sanity check against a plain-JAX reference of the PyTorch forward.
    hp = jnp.maximum(state @ params["w1p"] + params["b1p"], 0.0)
    ref_probs = jax.nn.softmax(hp @ params["w2p"] + params["b2p"], axis=-1)
    hv = jnp.maximum(state @ params["w1v"] + params["b1v"], 0.0)
    ref_value = (hv @ params["w2v"] + params["b2v"])[:, 0]

    assert probs.shape == (B, ACTION_DIM) and value.shape == (B,)
    assert jnp.allclose(probs, ref_probs, atol=1e-5)
    assert jnp.allclose(value, ref_value, atol=1e-5)
    assert jnp.allclose(jnp.sum(probs, axis=-1), 1.0, atol=1e-5)

    print("KERNEL_OK")
</pallas_src>

<mosaic_0001>
module attributes {stable_mosaic.version = 11 : i64} {
  func.func @_ppo_fused_kernel(%arg0: i32, %arg1: memref<8x16xf32, #tpu.memory_space<vmem>>, %arg2: memref<16x64xf32, #tpu.memory_space<vmem>>, %arg3: memref<1x64xf32, #tpu.memory_space<vmem>>, %arg4: memref<64x128xf32, #tpu.memory_space<vmem>>, %arg5: memref<1x128xf32, #tpu.memory_space<vmem>>, %arg6: memref<8x128xf32, #tpu.memory_space<vmem>>) attributes {dimension_semantics = [#tpu.dimension_semantics<parallel>], iteration_bounds = array<i64: 1>, scalar_prefetch = 0 : i64, scratch_operands = 0 : i64, tpu.core_type = #tpu.core_type<tc>, window_params = [{transform_indices = @transform_0, window_bounds = array<i64: 8, 16>}, {pipeline_mode = #tpu.pipeline_mode<synchronous>, transform_indices = @transform_1, window_bounds = array<i64: 16, 64>}, {pipeline_mode = #tpu.pipeline_mode<synchronous>, transform_indices = @transform_2, window_bounds = array<i64: 1, 64>}, {pipeline_mode = #tpu.pipeline_mode<synchronous>, transform_indices = @transform_3, window_bounds = array<i64: 64, 128>}, {pipeline_mode = #tpu.pipeline_mode<synchronous>, transform_indices = @transform_4, window_bounds = array<i64: 1, 128>}, {transform_indices = @transform_5, window_bounds = array<i64: 8, 128>}]} {
    %c0 = arith.constant 0 : index
    %c0_0 = arith.constant 0 : index
    %0 = vector.load %arg1[%c0, %c0_0] : memref<8x16xf32, #tpu.memory_space<vmem>>, vector<8x16xf32>
    %c0_1 = arith.constant 0 : index
    %c0_2 = arith.constant 0 : index
    %1 = vector.load %arg2[%c0_1, %c0_2] : memref<16x64xf32, #tpu.memory_space<vmem>>, vector<16x64xf32>
    %cst = arith.constant dense<0.000000e+00> : vector<8x64xf32>
    %2 = tpu.matmul %0, %1, %cst {dimension_numbers = #tpu.dot_dimension_numbers<[1], [0], [0], [1], [0, 0, 1, 1], [], []>} : vector<8x16xf32>, vector<16x64xf32>, vector<8x64xf32> -> vector<8x64xf32>
    %c0_3 = arith.constant 0 : index
    %c0_4 = arith.constant 0 : index
    %3 = vector.load %arg3[%c0_3, %c0_4] : memref<1x64xf32, #tpu.memory_space<vmem>>, vector<1x64xf32>
    %4 = vector.broadcast %3 : vector<1x64xf32> to vector<8x64xf32>
    %5 = arith.addf %2, %4 : vector<8x64xf32>
    %cst_5 = arith.constant 0.000000e+00 : f32
    %6 = vector.broadcast %cst_5 : f32 to vector<8x64xf32>
    %7 = arith.maximumf %5, %6 : vector<8x64xf32>
    %c0_6 = arith.constant 0 : index
    %c0_7 = arith.constant 0 : index
    %8 = vector.load %arg4[%c0_6, %c0_7] : memref<64x128xf32, #tpu.memory_space<vmem>>, vector<64x128xf32>
    %cst_8 = arith.constant dense<0.000000e+00> : vector<8x128xf32>
    %9 = tpu.matmul %7, %8, %cst_8 {dimension_numbers = #tpu.dot_dimension_numbers<[1], [0], [0], [1], [0, 0, 1, 1], [], []>} : vector<8x64xf32>, vector<64x128xf32>, vector<8x128xf32> -> vector<8x128xf32>
    %c0_9 = arith.constant 0 : index
    %c0_10 = arith.constant 0 : index
    %10 = vector.load %arg5[%c0_9, %c0_10] : memref<1x128xf32, #tpu.memory_space<vmem>>, vector<1x128xf32>
    %11 = vector.broadcast %10 : vector<1x128xf32> to vector<8x128xf32>
    %12 = arith.addf %9, %11 : vector<8x128xf32>
    %13 = tpu.iota {dimensions = array<i32: 1>} : vector<8x128xi32>
    %c4_i32 = arith.constant 4 : i32
    %14 = vector.broadcast %c4_i32 : i32 to vector<8x128xi32>
    %15 = arith.cmpi slt, %13, %14 : vector<8x128xi32>
    %cst_11 = arith.constant -1.000000e+30 : f32
    %16 = vector.broadcast %cst_11 : f32 to vector<8x128xf32>
    %17 = arith.select %15, %12, %16 : vector<8x128xi1>, vector<8x128xf32>
    %cst_12 = arith.constant dense<0xFF800000> : vector<8xf32>
    %18 = vector.multi_reduction <maximumf>, %17, %cst_12 [1] : vector<8x128xf32> to vector<8xf32>
    %19 = vector.shape_cast %18 : vector<8xf32> to vector<8x1xf32>
    %20 = vector.broadcast %19 : vector<8x1xf32> to vector<8x128xf32>
    %21 = arith.subf %17, %20 : vector<8x128xf32>
    %22 = math.exp %21 : vector<8x128xf32>
    %cst_13 = arith.constant dense<0.000000e+00> : vector<8xf32>
    %23 = vector.multi_reduction <add>, %22, %cst_13 [1] : vector<8x128xf32> to vector<8xf32>
    %24 = vector.shape_cast %23 : vector<8xf32> to vector<8x1xf32>
    %25 = tpu.reciprocal %24 : vector<8x1xf32> -> vector<8x1xf32>
    %26 = vector.broadcast %25 : vector<8x1xf32> to vector<8x128xf32>
    %27 = arith.mulf %22, %26 : vector<8x128xf32>
    %c4_i32_14 = arith.constant 4 : i32
    %28 = vector.broadcast %c4_i32_14 : i32 to vector<8x128xi32>
    %29 = arith.cmpi eq, %13, %28 : vector<8x128xi32>
    %30 = arith.select %29, %12, %27 : vector<8x128xi1>, vector<8x128xf32>
    %c0_15 = arith.constant 0 : index
    %c0_16 = arith.constant 0 : index
    %31 = vector.load %arg6[%c0_15, %c0_16] : memref<8x128xf32, #tpu.memory_space<vmem>>, vector<8x128xf32>
    tpu.vector_store %arg6[%c0_15, %c0_16], %30 {strides = array<i32>} : memref<8x128xf32, #tpu.memory_space<vmem>>, vector<8x128xf32>,
    return
  }
  func.func @transform_0(%arg0: i32) -> (i32, i32) {
    %c0_i32 = arith.constant 0 : i32
    %c0_i32_0 = arith.constant 0 : i32
    return %arg0, %c0_i32 : i32, i32
  }
  func.func @transform_1(%arg0: i32) -> (i32, i32) {
    %c0_i32 = arith.constant 0 : i32
    %c0_i32_0 = arith.constant 0 : i32
    %c0_i32_1 = arith.constant 0 : i32
    return %c0_i32, %c0_i32_0 : i32, i32
  }
  func.func @transform_2(%arg0: i32) -> (i32, i32) {
    %c0_i32 = arith.constant 0 : i32
    %c0_i32_0 = arith.constant 0 : i32
    %c0_i32_1 = arith.constant 0 : i32
    return %c0_i32, %c0_i32_0 : i32, i32
  }
  func.func @transform_3(%arg0: i32) -> (i32, i32) {
    %c0_i32 = arith.constant 0 : i32
    %c0_i32_0 = arith.constant 0 : i32
    %c0_i32_1 = arith.constant 0 : i32
    return %c0_i32, %c0_i32_0 : i32, i32
  }
  func.func @transform_4(%arg0: i32) -> (i32, i32) {
    %c0_i32 = arith.constant 0 : i32
    %c0_i32_0 = arith.constant 0 : i32
    %c0_i32_1 = arith.constant 0 : i32
    return %c0_i32, %c0_i32_0 : i32, i32
  }
  func.func @transform_5(%arg0: i32) -> (i32, i32) {
    %c0_i32 = arith.constant 0 : i32
    %c0_i32_0 = arith.constant 0 : i32
    return %arg0, %c0_i32 : i32, i32
  }
}

</mosaic_0001>

<bundles_post_ra>
// kernel: tpu_custom_call.1
= control target key start
LH: loop header
LB: loop body
LE: loop exit
PB: predicated region body
PF: predicated region fallthrough
CT: control target
= control target key end

     0   :  { %10 = vsyncpa [#allocation3], 0  ;;  %s351_s0 = inlined_call_operand.hbm [shape: f32[8,16], index: 0, kind: input, shape index: {}]   ;;  %s352_s1 = inlined_call_operand.hbm [shape: f32[16,64], index: 1, kind: input, shape index: {}]   ;;  %s353_s2 = inlined_call_operand.vmem [shape: f32[1,64], index: 2, kind: input, shape index: {}]   ;;  %s354_s3 = inlined_call_operand.hbm [shape: f32[64,128], index: 3, kind: input, shape index: {}]   ;;  %s355_s4 = inlined_call_operand.vmem [shape: f32[1,128], index: 4, kind: input, shape index: {}]   ;;  %s356_s5 = inlined_call_operand.hbm [shape: f32[8,128], index: 5, kind: output, shape index: {}]  }
   0x1   :  { %11 = vsyncpa [#allocation6], 0  ;;  %s28_s20 = sshll.u32 %s352_s1, 4  ;;  %s29_s20 = int_to_ptr.hbm [resolvable:$true] %s28_s20 }
   0x2   :  { %12 = vsyncpa [#allocation4], 0  ;;  %s297_s21 = smov [#allocation5]   ;;  %s18_s25 = sshll.u32 %s351_s0, 4  ;;  %s19_s25 = int_to_ptr.hbm [resolvable:$true] %s18_s25 }
   0x3   :  { %s30_s22 = sshll.u32 %s297_s21, 4  ;;  %s298_s26 = smov 128   ;;  %s31_s22 = int_to_ptr.vmem [resolvable:$true] %s30_s22 }
   0x4   :  { %s299_s27 = smov 8   ;;  %s300_s28 = smov [#allocation2]  }
   0x5   :  { %36 = dma.hbm_to_vmem [thread:$0]  %s29_s20, 256, %s31_s22, [#allocation6], %s298_s26, %s298_s26, %s299_s27  }
   0x6   :  { %s20_s29 = sshll.u32 %s300_s28, 4  ;;  %s43_s7 = sshll.u32 %s354_s3, 4  ;;  %s21_s29 = int_to_ptr.vmem [resolvable:$true] %s20_s29  ;;  %s44_s7 = int_to_ptr.hbm [resolvable:$true] %s43_s7 }
   0x7   :  { %23 = dma.hbm_to_vmem [thread:$0]  %s19_s25, 128, %s21_s29, [#allocation3]  }
   0x8   :  { %s301_s1 = smov [#allocation7]  }
   0x9   :  { %s45_s8 = sshll.u32 %s301_s1, 4  ;;  %s46_s8 = int_to_ptr.vmem [resolvable:$true] %s45_s8 }
   0xa   :  { %51 = dma.hbm_to_vmem [thread:$0]  %s44_s7, 1024, %s46_s8, [#allocation6], %s298_s26, %s298_s26, %s299_s27  }
   0xb   :  { %291 = dma.done.wait [#allocation3], 128  }
   0xc   :  { %292 = vsyncadd [#allocation3], 4294967168 }
   0xd   :  { %293 = dma.done.wait [#allocation6], 1280  }
   0xe   :  { %294 = vsyncadd [#allocation6], 4294966016  ;;  %v68_v0 = vld [vmem:[#allocation5 + $0x8] sm:$0xff]  ;;  %v67_v1 = vld [vmem:[#allocation5] sm:$0xff]  ;;  %vm73_vm0 = vcmask 130048   ;;  %vm110_vm1 = vcmask 523264   ;;  %v134_v15 = vlaneseq }
   0xf   :  { %91 = vmatpush.msra.mxu0 %v68_v0  ;;  %v66_v2 = vld [vmem:[#allocation2] sm:$0xff]  ;;  %v105_v3 = vld [vmem:[#allocation7 + $0x38] sm:$0xff]  ;;  %v104_v4 = vld [vmem:[#allocation7 + $0x30] sm:$0xff]  ;;  %s170_s13 = sshll.u32 %s356_s5, 4  ;;  %s171_s13 = int_to_ptr.hbm [resolvable:$true] %s170_s13 }
  0x10   :  { %122 = vmatpush.msra.mxu1 %v105_v3  ;;  %v103_v5 = vld [vmem:[#allocation7 + $0x28] sm:$0xff]  ;;  %v102_v6 = vld [vmem:[#allocation7 + $0x20] sm:$0xff]  ;;  %v101_v7 = vld [vmem:[#allocation7 + $0x18] sm:$0xff]  ;;  %v135_v16 = vand.u32 127, %v134_v15 }
  0x11   :  { %92 = vmatpush.msra.mxu0 %v67_v1  ;;  %v100_v8 = vld [vmem:[#allocation7 + $0x10] sm:$0xff]  ;;  %v99_v9 = vld [vmem:[#allocation7 + $0x8] sm:$0xff]  ;;  %v98_v10 = vld [vmem:[#allocation7] sm:$0xff] }
  0x12   :  { %181 = vmatmul.msk.f32.vlgmr.msra.gmra.mxu0 %vm73_vm0, %v66_v2  ;;  %123 = vmatpush.msra.mxu1 %v104_v4  ;;  %v189_v11 = vld [vmem:[%s353_s2] ss:$0 sm:$0xff]  ;;  %vm136_vm2 = vcmp.lt.s32.totalorder %v135_v16, 4  ;;  %s302_s2 = smov [#allocation8]   ;;  %vm160_vm7 = vcmp.eq.s32.totalorder %v135_v16, 4 }
  0x13   :  { %v190_v17 = vld [vmem:[%s355_s4] ss:$0 sm:$0xff]  ;;  %s168_s4 = sshll.u32 %s302_s2, 4  ;;  %s169_s4 = int_to_ptr.vmem [resolvable:$true] %s168_s4 }
  0x14   :  { %124 = vmatpush.msra.mxu1 %v103_v5 }
  0x16   :  { %125 = vmatpush.msra.mxu1 %v102_v6 }
  0x18   :  { %126 = vmatpush.msra.mxu1 %v101_v7 }
  0x1a   :  { %127 = vmatpush.msra.mxu1 %v100_v8 }
  0x1c   :  { %128 = vmatpush.msra.mxu1 %v99_v9 }
  0x1e   :  { %129 = vmatpush.msra.mxu1 %v98_v10 }
  0x8f   :  { %v94_v12 = vpop.f32.mrf.mxu0 }
  0x90   :  { %v95_v13 = vadd.f32 %v189_v11, %v94_v12 }
  0x92   :  { %v97_v14 = vmax.f32 %v95_v13, 0.0 }
  0x94   :  { %182 = vmatmul.msk.f32.vlgmr.msra.gmra.mxu1 %vm110_vm1, %v97_v14 }
 0x111   :  { %v131_v18 = vpop.f32.mrf.mxu1 }
 0x112   :  { %v132_v19 = vadd.f32 %v190_v17, %v131_v18 }
 0x114   :  { %v137_v20 = vsel %vm136_vm2, %v132_v19, -1e+30 }
 0x115   :  { %138 = vmax.xlane.f32.xlu0 %v137_v20 }
 0x188   :  { %v139_v21 = vpop.xlane.xlu0 %138 }
 0x189   :  { %v140_v22 = vsub.f32 %v137_v20, %v139_v21 }
 0x18b   :  { %v141_v23 = vmul.f32 1.442695, %v140_v22 }
 0x18d   :  { %191 = vpow2.f32 %v141_v23 }
 0x193   :  { %v192_v24 = vpop.eup %191 }
 0x194   :  { %143 = vadd.xlane.f32.xlu0 %v192_v24 }
 0x207   :  { %v144_v25 = vpop.xlane.xlu0 %143 }
 0x208   :  { %193 = vrcp.f32 %v144_v25  ;;  %v156_v29 = vand.u32 2147483648, %v144_v25  ;;  %v154_v31 = vand.u32 2147483647, %v144_v25  ;;  %vm150_vm4 = vweird.f32 %v144_v25 }
 0x20a   :  { %v157_v33 = vor.u32 1.1754944e-38, %v156_v29  ;;  %vm155_vm6 = vcmp.eq.f32.partialorder %v154_v31, 8.507059e+37 }
 0x20e   :  { %v194_v26 = vpop.eup %193 }
 0x20f   :  { %v146_v27 = vmul.f32 %v194_v26, %v144_v25  ;;  %vm151_vm3 = vweird.f32 %v194_v26 }
 0x210   :  { %vm152_vm5 = vmor %vm150_vm4, %vm151_vm3 }
 0x211   :  { %v147_v28 = vsub.f32 1.0, %v146_v27 }
 0x213   :  { %v148_v30 = vmul.f32 %v194_v26, %v147_v28 }
 0x215   :  { %v149_v32 = vadd.f32 %v194_v26, %v148_v30 }
 0x217   :  { %v153_v34 = vsel %vm152_vm5, %v194_v26, %v149_v32 }
 0x218   :  { %v158_v35 = vsel %vm155_vm6, %v157_v33, %v153_v34 }
 0x219   :  { %v159_v36 = vmul.f32 %v192_v24, %v158_v35 }
 0x21b   :  { %v161_v37 = vsel %vm160_vm7, %v132_v19, %v159_v36 }
 0x21c   :  { %162 = vst [vmem:[#allocation8] sm:$0xff] %v161_v37 }
 0x21d   :  { %173 = dma.vmem_to_hbm [thread:$0]  %s169_s4, 128, %s171_s13, [#allocation4]  }
 0x21e   :  { %295 = dma.done.wait [#allocation4], 128  }
 0x21f   :  { %296 = vsyncadd [#allocation4], 4294967168 }
 0x220   :  { %178 = vsyncpa [#allocation3], 1 }
 0x221   :  { %179 = vsyncpa [#allocation6], 1 }
 0x222   :  { %180 = vsyncpa [#allocation4], 1 }

</bundles_post_ra>
